<compile_context>
chip_gen: v7x
topology: tpu7x:2x2x1
jax: 0.10.0
libtpu: 0.0.40
codegen_flags: <defaults>
</compile_context>

<pallas_src>
import functools

import jax
import jax.numpy as jnp
from jax.experimental import pallas as pl
from jax.experimental.pallas import tpu as pltpu


def _round_up(x, m):
    return ((x + m - 1) // m) * m


def dqn_kernel(x_ref, w1_ref, b1_ref, w2_ref, b2_ref, o_ref):
    # (TB, S) @ (S, Hp) -> (TB, Hp) on the MXU, f32 accumulation.
    h = jnp.dot(x_ref[...], w1_ref[...], preferred_element_type=jnp.float32)
    h = jnp.maximum(h + b1_ref[...], 0.0)          # bias + ReLU on the VPU, f32
    # (TB, Hp) @ (Hp, A) -> (TB, A) on the MXU (A is unpadded, e.g. 4).
    o = jnp.dot(h.astype(w2_ref.dtype), w2_ref[...],
                preferred_element_type=jnp.float32)
    o_ref[...] = (o + b2_ref[...]).astype(o_ref.dtype)


def prepare_params(w1, b1, w2, b2, *, mxu_input_dtype=jnp.float32):
    """Pad weights once at init (hidden dim -> multiple of 128 lanes).

    Zero-padding the hidden dim is numerically exact: relu(0 + 0) = 0 and the
    matching zero rows of w2 contribute nothing.  Set
    mxu_input_dtype=jnp.bfloat16 to halve weight/x HBM reads (v5e/v6e); the
    biases stay f32 so bias + ReLU remain on the f32 VPU path.
    """
    H = w1.shape[1]
    Hp = _round_up(H, 128)
    w1p = jnp.pad(w1, ((0, 0), (0, Hp - H))).astype(mxu_input_dtype)
    b1p = jnp.pad(b1, ((0, 0), (0, Hp - H)))
    w2p = jnp.pad(w2, ((0, Hp - H), (0, 0))).astype(mxu_input_dtype)
    return w1p, b1p, w2p, b2


@functools.partial(jax.jit, static_argnames=("batch_tile",))
def dqn_forward(x, w1p, b1p, w2p, b2, *, batch_tile=1024):
    """forward(x) = relu(x @ w1 + b1) @ w2 + b2, params from prepare_params.

    x   : (B, S) f32
    w1p : (S, Hp)   (Hp = H rounded to 128; transpose of PyTorch fc1.weight)
    b1p : (1, Hp)
    w2p : (Hp, A)   (transpose of PyTorch fc2.weight)
    b2  : (1, A)
    """
    B, S = x.shape
    Hp = w1p.shape[1]
    A = w2p.shape[1]

    # Batch padded only to a multiple of 8 sublanes (<8 wasted rows).
    Bp = _round_up(B, 8)

    # Batch tile: multiple of 8, at most batch_tile; at large batch cap near
    # Bp/2 so the "parallel" grid axis has >=2 steps (v7x dual-TC sharding).
    TB = min(batch_tile, Bp)
    if Bp >= 512:
        TB = min(TB, _round_up((Bp + 1) // 2, 8))
    grid = pl.cdiv(Bp, TB)

    xp = jnp.pad(x, ((0, Bp - B), (0, 0))) if Bp != B else x
    xp = xp.astype(w1p.dtype)      # optional bf16 MXU-input path (f32 default)

    # Advisory cost using the padded shapes actually moved / computed.
    cost = pl.CostEstimate(
        flops=2 * grid * TB * (S * Hp + Hp * A),
        transcendentals=0,
        bytes_accessed=(xp.dtype.itemsize * Bp * S
                        + w1p.dtype.itemsize * (S * Hp + Hp * A)
                        + 4 * (Hp + A)
                        + 4 * Bp * A),
    )

    out = pl.pallas_call(
        dqn_kernel,
        out_shape=jax.ShapeDtypeStruct((Bp, A), jnp.float32),
        grid=(grid,),
        in_specs=[
            # x streams in TB-row tiles; Pallas double-buffers automatically so
            # DMA of tile i+1 hides under compute of tile i.
            pl.BlockSpec((TB, S), lambda i: (i, 0)),
            # Weights / biases: constant index_map -> VMEM-resident across the
            # whole grid (no re-DMA per tile).  VMEM use is ~100 KiB, far
            # below the scoped limit on every generation (incl. v5e's 16 MiB).
            pl.BlockSpec((S, Hp), lambda i: (0, 0)),
            pl.BlockSpec((1, Hp), lambda i: (0, 0)),
            pl.BlockSpec((Hp, A), lambda i: (0, 0)),
            pl.BlockSpec((1, A), lambda i: (0, 0)),
        ],
        # Unpadded minor dim A (== full array dim): 16 B of output per row
        # instead of 512 B, and no padded-slab slice in the wrapper.
        out_specs=pl.BlockSpec((TB, A), lambda i: (i, 0)),
        compiler_params=pltpu.CompilerParams(
            dimension_semantics=("parallel",),
        ),
        cost_estimate=cost,
    )(xp, w1p, b1p, w2p, b2)

    return out[:B] if Bp != B else out


def init_params(key, state_feature_count, h1_node_count, action_feature_count):
    """Deterministic synthetic init (PyTorch-Linear-style uniform bounds)."""
    k1, k2, k3, k4 = jax.random.split(key, 4)
    lim1 = 1.0 / jnp.sqrt(jnp.float32(state_feature_count))
    lim2 = 1.0 / jnp.sqrt(jnp.float32(h1_node_count))
    w1 = jax.random.uniform(k1, (state_feature_count, h1_node_count),
                            jnp.float32, -lim1, lim1)
    b1 = jax.random.uniform(k2, (1, h1_node_count), jnp.float32, -lim1, lim1)
    w2 = jax.random.uniform(k3, (h1_node_count, action_feature_count),
                            jnp.float32, -lim2, lim2)
    b2 = jax.random.uniform(k4, (1, action_feature_count), jnp.float32,
                            -lim2, lim2)
    return w1, b1, w2, b2


if __name__ == "__main__":
    # DQN-for-snake shapes: state_feature_count=16, h1_node_count=32,
    # action_feature_count=4, batch=2.
    B, S, H, A = 2, 16, 32, 4

    key = jax.random.PRNGKey(0)
    kx, kp = jax.random.split(key)
    x = jax.random.normal(kx, (B, S), jnp.float32)
    w1, b1, w2, b2 = init_params(kp, S, H, A)

    # Pad params once (hoisted out of the forward); keep f32 MXU inputs so the
    # result matches the reference exactly.
    w1p, b1p, w2p, b2p = prepare_params(w1, b1, w2, b2)

    out = dqn_forward(x, w1p, b1p, w2p, b2p)
    out = jax.block_until_ready(out)

    # Pure-JAX reference of the same math.
    ref = jnp.maximum(x @ w1 + b1, 0.0) @ w2 + b2
    assert out.shape == (B, A)
    assert jnp.allclose(out, ref, atol=1e-5, rtol=1e-5)

    print("KERNEL_OK")
</pallas_src>

<mosaic_0001>
module attributes {stable_mosaic.version = 11 : i64} {
  func.func @dqn_kernel(%arg0: i32, %arg1: memref<8x16xf32, #tpu.memory_space<vmem>>, %arg2: memref<16x128xf32, #tpu.memory_space<vmem>>, %arg3: memref<1x128xf32, #tpu.memory_space<vmem>>, %arg4: memref<128x4xf32, #tpu.memory_space<vmem>>, %arg5: memref<1x4xf32, #tpu.memory_space<vmem>>, %arg6: memref<8x4xf32, #tpu.memory_space<vmem>>) attributes {dimension_semantics = [#tpu.dimension_semantics<parallel>], iteration_bounds = array<i64: 1>, scalar_prefetch = 0 : i64, scratch_operands = 0 : i64, tpu.core_type = #tpu.core_type<tc>, window_params = [{transform_indices = @transform_0, window_bounds = array<i64: 8, 16>}, {pipeline_mode = #tpu.pipeline_mode<synchronous>, transform_indices = @transform_1, window_bounds = array<i64: 16, 128>}, {pipeline_mode = #tpu.pipeline_mode<synchronous>, transform_indices = @transform_2, window_bounds = array<i64: 1, 128>}, {pipeline_mode = #tpu.pipeline_mode<synchronous>, transform_indices = @transform_3, window_bounds = array<i64: 128, 4>}, {pipeline_mode = #tpu.pipeline_mode<synchronous>, transform_indices = @transform_4, window_bounds = array<i64: 1, 4>}, {transform_indices = @transform_5, window_bounds = array<i64: 8, 4>}]} {
    %c0 = arith.constant 0 : index
    %c0_0 = arith.constant 0 : index
    %0 = vector.load %arg1[%c0, %c0_0] : memref<8x16xf32, #tpu.memory_space<vmem>>, vector<8x16xf32>
    %c0_1 = arith.constant 0 : index
    %c0_2 = arith.constant 0 : index
    %1 = vector.load %arg2[%c0_1, %c0_2] : memref<16x128xf32, #tpu.memory_space<vmem>>, vector<16x128xf32>
    %cst = arith.constant dense<0.000000e+00> : vector<8x128xf32>
    %2 = tpu.matmul %0, %1, %cst {dimension_numbers = #tpu.dot_dimension_numbers<[1], [0], [0], [1], [0, 0, 1, 1], [], []>} : vector<8x16xf32>, vector<16x128xf32>, vector<8x128xf32> -> vector<8x128xf32>
    %c0_3 = arith.constant 0 : index
    %c0_4 = arith.constant 0 : index
    %3 = vector.load %arg3[%c0_3, %c0_4] : memref<1x128xf32, #tpu.memory_space<vmem>>, vector<1x128xf32>
    %4 = vector.broadcast %3 : vector<1x128xf32> to vector<8x128xf32>
    %5 = arith.addf %2, %4 : vector<8x128xf32>
    %cst_5 = arith.constant 0.000000e+00 : f32
    %6 = vector.broadcast %cst_5 : f32 to vector<8x128xf32>
    %7 = arith.maximumf %5, %6 : vector<8x128xf32>
    %c0_6 = arith.constant 0 : index
    %c0_7 = arith.constant 0 : index
    %8 = vector.load %arg4[%c0_6, %c0_7] : memref<128x4xf32, #tpu.memory_space<vmem>>, vector<128x4xf32>
    %cst_8 = arith.constant dense<0.000000e+00> : vector<8x4xf32>
    %9 = tpu.matmul %7, %8, %cst_8 {dimension_numbers = #tpu.dot_dimension_numbers<[1], [0], [0], [1], [0, 0, 1, 1], [], []>} : vector<8x128xf32>, vector<128x4xf32>, vector<8x4xf32> -> vector<8x4xf32>
    %c0_9 = arith.constant 0 : index
    %c0_10 = arith.constant 0 : index
    %10 = vector.load %arg5[%c0_9, %c0_10] : memref<1x4xf32, #tpu.memory_space<vmem>>, vector<1x4xf32>
    %11 = vector.broadcast %10 : vector<1x4xf32> to vector<8x4xf32>
    %12 = arith.addf %9, %11 : vector<8x4xf32>
    %c0_11 = arith.constant 0 : index
    %c0_12 = arith.constant 0 : index
    %13 = vector.load %arg6[%c0_11, %c0_12] : memref<8x4xf32, #tpu.memory_space<vmem>>, vector<8x4xf32>
    tpu.vector_store %arg6[%c0_11, %c0_12], %12 {strides = array<i32>} : memref<8x4xf32, #tpu.memory_space<vmem>>, vector<8x4xf32>,
    return
  }
  func.func @transform_0(%arg0: i32) -> (i32, i32) {
    %c0_i32 = arith.constant 0 : i32
    %c0_i32_0 = arith.constant 0 : i32
    return %arg0, %c0_i32 : i32, i32
  }
  func.func @transform_1(%arg0: i32) -> (i32, i32) {
    %c0_i32 = arith.constant 0 : i32
    %c0_i32_0 = arith.constant 0 : i32
    %c0_i32_1 = arith.constant 0 : i32
    return %c0_i32, %c0_i32_0 : i32, i32
  }
  func.func @transform_2(%arg0: i32) -> (i32, i32) {
    %c0_i32 = arith.constant 0 : i32
    %c0_i32_0 = arith.constant 0 : i32
    %c0_i32_1 = arith.constant 0 : i32
    return %c0_i32, %c0_i32_0 : i32, i32
  }
  func.func @transform_3(%arg0: i32) -> (i32, i32) {
    %c0_i32 = arith.constant 0 : i32
    %c0_i32_0 = arith.constant 0 : i32
    %c0_i32_1 = arith.constant 0 : i32
    return %c0_i32, %c0_i32_0 : i32, i32
  }
  func.func @transform_4(%arg0: i32) -> (i32, i32) {
    %c0_i32 = arith.constant 0 : i32
    %c0_i32_0 = arith.constant 0 : i32
    %c0_i32_1 = arith.constant 0 : i32
    return %c0_i32, %c0_i32_0 : i32, i32
  }
  func.func @transform_5(%arg0: i32) -> (i32, i32) {
    %c0_i32 = arith.constant 0 : i32
    %c0_i32_0 = arith.constant 0 : i32
    return %arg0, %c0_i32 : i32, i32
  }
}

</mosaic_0001>

<bundles_post_ra>
// kernel: dqn_forward.1
= control target key start
LH: loop header
LB: loop body
LE: loop exit
PB: predicated region body
PF: predicated region fallthrough
CT: control target
= control target key end

     0   :  { %v299_v0 = vmov 0.0|0.0   ;;  %vm300_vm0 = vmmov 0   ;;  %v301_v3 = vmov 0.0   ;;  %vm30_vm1 = vcmask 130048   ;;  %s398_s1 = inlined_call_operand.vmem [shape: f32[16,128], index: 1, kind: input, shape index: {}]   ;;  %s399_s3 = inlined_call_operand.vmem [shape: f32[128,4], index: 3, kind: input, shape index: {}]   ;;  %s400_s0 = inlined_call_operand.vmem [shape: f32[8,16], index: 0, kind: input, shape index: {}]   ;;  %s401_s2 = inlined_call_operand.vmem [shape: f32[1,128], index: 2, kind: input, shape index: {}]   ;;  %s402_s4 = inlined_call_operand.vmem [shape: f32[1,4], index: 4, kind: input, shape index: {}]   ;;  %s403_s5 = inlined_call_operand.vmem [shape: f32[8,4], index: 5, kind: output, shape index: {}]  }
   0x1   :  { %269 = vmatprep.subr.bf16.mxu0 %v299_v0  ;;  %v21_v1 = vld [vmem:[%s398_s1] sm:$0xff]  ;;  %v22_v2 = vld [vmem:[%s398_s1 + $0x8] sm:$0xff]  ;;  %231 = vmatprep.mubr.msk.f32.mxu0 %vm300_vm0, %v301_v3  ;;  %v107_v7 = vld [vmem:[%s399_s3 + $0x10] sm:$0xff]  ;;  %vm198_vm2 = vcmask 31744  }
   0x2   :  { %v270_v4 = vpack.c.bf16 %v22_v2, %v21_v1  ;;  %272 = vmatprep.subr.bf16.mxu1 %v299_v0  ;;  %v105_v5 = vld [vmem:[%s399_s3] sm:$0xff]  ;;  %v106_v6 = vld [vmem:[%s399_s3 + $0x8] sm:$0xff]  ;;  %266 = vmatprep.mubr.msk.f32.mxu1 %vm300_vm0, %v301_v3  ;;  %v108_v9 = vld [vmem:[%s399_s3 + $0x18] sm:$0xff] }
   0x3   :  { %v273_v8 = vpack.c.bf16 %v106_v6, %v105_v5  ;;  %v20_v10 = vld [vmem:[%s400_s0] sm:$0xff]  ;;  %v276_v11 = vpack.c.bf16 %v108_v9, %v107_v7  ;;  %v110_v13 = vld [vmem:[%s399_s3 + $0x28] sm:$0xff]  ;;  %v111_v15 = vld [vmem:[%s399_s3 + $0x30] sm:$0xff] }
   0x4   :  { %271 = vmatpush3.bf16.msra.mxu0 %v270_v4  ;;  %v109_v12 = vld [vmem:[%s399_s3 + $0x20] sm:$0xff]  ;;  %v112_v16 = vld [vmem:[%s399_s3 + $0x38] sm:$0xff]  ;;  %v114_v19 = vld [vmem:[%s399_s3 + $0x48] sm:$0xff] }
   0x5   :  { %274 = vmatpush3.bf16.msra.mxu1 %v273_v8  ;;  %v279_v14 = vpack.c.bf16 %v110_v13, %v109_v12  ;;  %v282_v17 = vpack.c.bf16 %v112_v16, %v111_v15  ;;  %v113_v18 = vld [vmem:[%s399_s3 + $0x40] sm:$0xff]  ;;  %v115_v21 = vld [vmem:[%s399_s3 + $0x50] sm:$0xff]  ;;  %v116_v22 = vld [vmem:[%s399_s3 + $0x58] sm:$0xff] }
   0x6   :  { %275 = vmatprep.subr.bf16.mxu1 %v299_v0  ;;  %v285_v20 = vpack.c.bf16 %v114_v19, %v113_v18  ;;  %v288_v23 = vpack.c.bf16 %v116_v22, %v115_v21  ;;  %v117_v24 = vld [vmem:[%s399_s3 + $0x60] sm:$0xff]  ;;  %v118_v25 = vld [vmem:[%s399_s3 + $0x68] sm:$0xff]  ;;  %v119_v27 = vld [vmem:[%s399_s3 + $0x70] sm:$0xff] }
   0x7   :  { %232 = vmatmul.mubr.msk.f32.vlgmr.msra.gmra.mrb[0].mxu0 %vm30_vm1, %v20_v10  ;;  %v291_v26 = vpack.c.bf16 %v118_v25, %v117_v24  ;;  %v120_v28 = vld [vmem:[%s399_s3 + $0x78] sm:$0xff]  ;;  %v204_v30 = vld [vmem:[%s401_s2] ss:$0 sm:$0xff] }
   0x8   :  { %v294_v29 = vpack.c.bf16 %v120_v28, %v119_v27  ;;  %v206_v35 = vld [vmem:[%s402_s4] ss:$0 sm:$0xff] }
   0x9   :  { %277 = vmatpush3.bf16.msra.mxu1 %v276_v11 }
   0xa   :  { %278 = vmatprep.subr.bf16.mxu1 %v299_v0 }
   0xd   :  { %280 = vmatpush3.bf16.msra.mxu1 %v279_v14 }
   0xe   :  { %281 = vmatprep.subr.bf16.mxu1 %v299_v0 }
  0x11   :  { %283 = vmatpush3.bf16.msra.mxu1 %v282_v17 }
  0x12   :  { %284 = vmatprep.subr.bf16.mxu1 %v299_v0 }
  0x15   :  { %286 = vmatpush3.bf16.msra.mxu1 %v285_v20 }
  0x16   :  { %287 = vmatprep.subr.bf16.mxu1 %v299_v0 }
  0x19   :  { %289 = vmatpush3.bf16.msra.mxu1 %v288_v23 }
  0x1a   :  { %290 = vmatprep.subr.bf16.mxu1 %v299_v0 }
  0x1d   :  { %292 = vmatpush3.bf16.msra.mxu1 %v291_v26 }
  0x1e   :  { %293 = vmatprep.subr.bf16.mxu1 %v299_v0 }
  0x21   :  { %295 = vmatpush3.bf16.msra.mxu1 %v294_v29 }
  0xda   :  { %v100_v31 = vpop.f32.mrb[0].mxu0 }
  0xdb   :  { %v101_v32 = vadd.f32 %v204_v30, %v100_v31  ;;  %v233_v33 = vpop.f32.mrb[1].mxu0 }
  0xdd   :  { %v104_v34 = vmax.f32 %v101_v32, 0.0 }
  0xdf   :  { %267 = vmatmul.mubr.f32.vlgmr.msra.gmra.mrb[0].mxu1 %v104_v34 }
 0x1b2   :  { %v194_v36 = vpop.f32.mrb[0].mxu1 }
 0x1b3   :  { %v195_v37 = vadd.f32 %v206_v35, %v194_v36  ;;  %v268_v38 = vpop.f32.mrb[1].mxu1 }
 0x1b5   :  { %199 = vst.msk [vmem:[%s403_s5] sm:$0xff] %vm198_vm2, %v195_v37 }

</bundles_post_ra>
